<compile_context>
chip_gen: v7x
topology: tpu7x:2x2x1
jax: 0.10.0
libtpu: 0.0.40
codegen_flags: <defaults>
</compile_context>

<pallas_src>
import functools
import math

import jax
import jax.numpy as jnp
from jax.experimental import pallas as pl
from jax.experimental.pallas import tpu as pltpu


# ----------------------------- in-kernel helpers -----------------------------

def _layer_norm(x, gamma, beta, eps=1e-5):
    # x: (S, D) f32, gamma/beta: (1, D) f32.  Matches torch.nn.LayerNorm(d_model).
    mean = jnp.mean(x, axis=-1, keepdims=True)
    var = jnp.mean(jnp.square(x - mean), axis=-1, keepdims=True)
    return (x - mean) * jax.lax.rsqrt(var + eps) * gamma + beta


# ------------------------------ Pallas kernel ---------------------------------

def encoder_stack_kernel(x_ref,                                   # (1, S, D) bf16
                         wqkv_ref, bqkv_ref,                      # (1, D, 3D) bf16, (1, 1, 3D) f32
                         wo_ref, bo_ref,                          # (1, D, D)  bf16, (1, 1, D)  f32
                         w1_ref, b1_ref,                          # (1, D, F)  bf16, (1, 1, F)  f32
                         w2_ref, b2_ref,                          # (1, F, D)  bf16, (1, 1, D)  f32
                         g1_ref, be1_ref, g2_ref, be2_ref,        # (1, 1, D)  f32
                         gf_ref, bf_ref,                          # (1, D)     f32 (final LN)
                         o_ref,                                   # (1, S, D)  f32
                         act_ref,                                 # VMEM (S, D) f32 scratch
                         *, num_heads):
    layer = pl.program_id(1)
    n_layers = pl.num_programs(1)
    S, D = act_ref.shape
    H = num_heads
    hd = D // H
    scale = 1.0 / math.sqrt(hd)

    # On the first layer of each batch element, load the embedding into the
    # resident f32 activation scratch.  It stays in VMEM for all L layers.
    @pl.when(layer == 0)
    def _():
        act_ref[...] = x_ref[0].astype(jnp.float32)

    x = act_ref[...]                                   # (S, D) f32 residual stream
    x_bf = x.astype(jnp.bfloat16)

    # ---- fused QKV projection: one full-width (S, D) @ (D, 3D) matmul ------
    qkv = jnp.dot(x_bf, wqkv_ref[0],
                  preferred_element_type=jnp.float32) + bqkv_ref[0]   # (S, 3D) f32

    # Split heads via static lane slices right before the score matmul
    # (lane-dense layout kept as long as possible).
    heads = [qkv[:, a * hd:(a + 1) * hd] for a in range(3 * H)]        # each (S, hd)
    qkv_h = jnp.stack(heads, axis=0)                                   # (3H, S, hd)
    q = qkv_h[0:H] * scale
    k = qkv_h[H:2 * H]
    v = qkv_h[2 * H:3 * H]

    # ---- scaled dot-product attention (batched over heads) -----------------
    s = jnp.einsum('hqe,hke->hqk',
                   q.astype(jnp.bfloat16), k.astype(jnp.bfloat16),
                   preferred_element_type=jnp.float32)                 # (H, S, S) f32
    s = s - jnp.max(s, axis=-1, keepdims=True)
    p = jnp.exp(s)
    denom = jnp.sum(p, axis=-1, keepdims=True)                         # (H, S, 1)
    ctx = jnp.einsum('hqk,hke->hqe',
                     p.astype(jnp.bfloat16), v.astype(jnp.bfloat16),
                     preferred_element_type=jnp.float32)               # (H, S, hd)
    # Deferred softmax normalization: one EUP reciprocal on (H, S, 1) instead
    # of dividing the whole (H, S, S) probability matrix.
    ctx = ctx * pl.reciprocal(denom, approx=True)

    # ---- output projection: heads folded back into the contraction dim -----
    ctx2d = jnp.concatenate([ctx[h] for h in range(H)], axis=-1)       # (S, D)
    attn = jnp.dot(ctx2d.astype(jnp.bfloat16), wo_ref[0],
                   preferred_element_type=jnp.float32) + bo_ref[0]     # (S, D)

    # residual + LayerNorm 1   (dropout = identity in eval mode)
    x1 = _layer_norm(x + attn, g1_ref[0], be1_ref[0])

    # ---- position-wise feed-forward -----------------------------------------
    h1 = jnp.dot(x1.astype(jnp.bfloat16), w1_ref[0],
                 preferred_element_type=jnp.float32) + b1_ref[0]
    h1 = jnp.maximum(h1, 0.0)
    ff = jnp.dot(h1.astype(jnp.bfloat16), w2_ref[0],
                 preferred_element_type=jnp.float32) + b2_ref[0]

    # residual + LayerNorm 2
    x2 = _layer_norm(x1 + ff, g2_ref[0], be2_ref[0])

    # Carry the residual stream (f32) to the next layer in VMEM scratch.
    act_ref[...] = x2

    # Final encoder LayerNorm + single HBM writeback on the last layer.
    @pl.when(layer == n_layers - 1)
    def _():
        o_ref[0] = _layer_norm(x2, gf_ref[...], bf_ref[...]).astype(o_ref.dtype)


# ------------------------------- JAX wrapper -----------------------------------

def encoder_forward(src, params, num_heads):
    # src: (B, S) int32 token ids
    B, S = src.shape
    D = params['emb'].shape[1]
    L = params['wqkv'].shape[0]
    F = params['w1'].shape[-1]

    # Embedding gather + sinusoidal positional encoding: XLA glue (not the hot
    # path).  Activations cross the pallas_call boundary in bf16 (half the HBM
    # traffic); residual math inside the kernel is f32.
    x = jnp.take(params['emb'], src, axis=0) + params['pe'][None, :S, :]
    x = x.astype(jnp.bfloat16)                                  # (B, S, D)

    kernel = functools.partial(encoder_stack_kernel, num_heads=num_heads)

    def layer_block(*shape):
        # Per-layer weight tile: select layer l along the leading axis.
        return pl.BlockSpec((1,) + shape,
                            lambda b, l, _n=len(shape): (l,) + (0,) * _n)

    grid_spec = pltpu.PrefetchScalarGridSpec(
        num_scalar_prefetch=0,
        grid=(B, L),                          # batch "parallel", layers "arbitrary"
        in_specs=[
            pl.BlockSpec((1, S, D), lambda b, l: (b, 0, 0)),   # x (resident across l)
            layer_block(D, 3 * D),    # wqkv
            layer_block(1, 3 * D),    # bqkv
            layer_block(D, D),        # wo
            layer_block(1, D),        # bo
            layer_block(D, F),        # w1
            layer_block(1, F),        # b1
            layer_block(F, D),        # w2
            layer_block(1, D),        # b2
            layer_block(1, D),        # g1
            layer_block(1, D),        # be1
            layer_block(1, D),        # g2
            layer_block(1, D),        # be2
            pl.BlockSpec((1, D), lambda b, l: (0, 0)),         # final gamma
            pl.BlockSpec((1, D), lambda b, l: (0, 0)),         # final beta
        ],
        out_specs=pl.BlockSpec((1, S, D), lambda b, l: (b, 0, 0)),
        scratch_shapes=[pltpu.VMEM((S, D), jnp.float32)],       # resident residual stream
    )

    return pl.pallas_call(
        kernel,
        out_shape=jax.ShapeDtypeStruct((B, S, D), jnp.float32),
        grid_spec=grid_spec,
        compiler_params=pltpu.CompilerParams(
            dimension_semantics=("parallel", "arbitrary"),
            vmem_limit_bytes=48 * 1024 * 1024),
    )(x,
      params['wqkv'], params['bqkv'], params['wo'], params['bo'],
      params['w1'], params['b1'], params['w2'], params['b2'],
      params['g1'], params['be1'], params['g2'], params['be2'],
      params['final_gamma'], params['final_beta'])


# ----------------------------- parameter creation -------------------------------

def init_encoder_params(key, num_layers, d_model, num_heads, d_ff, vocab_size, max_len):
    """Creates parameters already laid out for the kernel.

    Linear weights use the (in, out) convention (y = x @ W + b, i.e. PyTorch
    weight transposed).  Attention weights are fused lane-dense on the host:
    Wqkv -> (L, D, 3D), Wo -> (L, D, D).  Matmul weights are stored in bf16
    (MXU operands); biases / LayerNorm params stay f32.  All per-layer tensors
    are stacked along a leading L axis so a single pallas_call can select them
    with a layer grid axis.
    """
    assert d_model % num_heads == 0, "d_model must be divisible by num_heads"
    assert d_model % 2 == 0, "sinusoidal PE assumes even d_model"
    D, F, L = d_model, d_ff, num_layers

    keys = jax.random.split(key, 1 + num_layers)
    emb = jax.random.normal(keys[0], (vocab_size, D), jnp.float32) * 0.05

    # sinusoidal positional encoding table
    pos = jnp.arange(max_len, dtype=jnp.float32)[:, None]
    i = jnp.arange(D // 2, dtype=jnp.float32)[None, :]
    angle = pos / jnp.power(10000.0, (2.0 * i) / D)
    pe = jnp.zeros((max_len, D), jnp.float32)
    pe = pe.at[:, 0::2].set(jnp.sin(angle)).at[:, 1::2].set(jnp.cos(angle))

    wqkv, wo, w1, w2 = [], [], [], []
    for li in range(num_layers):
        lk = jax.random.split(keys[1 + li], 6)
        scl = 0.05
        wq = jax.random.normal(lk[0], (D, D), jnp.float32) * scl
        wk = jax.random.normal(lk[1], (D, D), jnp.float32) * scl
        wv = jax.random.normal(lk[2], (D, D), jnp.float32) * scl
        wqkv.append(jnp.concatenate([wq, wk, wv], axis=1))          # (D, 3D)
        wo.append(jax.random.normal(lk[3], (D, D), jnp.float32) * scl)
        w1.append(jax.random.normal(lk[4], (D, F), jnp.float32) * scl)
        w2.append(jax.random.normal(lk[5], (F, D), jnp.float32) * scl)

    params = {
        'emb': emb,
        'pe': pe,
        'wqkv': jnp.stack(wqkv).astype(jnp.bfloat16),               # (L, D, 3D)
        'bqkv': jnp.zeros((L, 1, 3 * D), jnp.float32),
        'wo': jnp.stack(wo).astype(jnp.bfloat16),                   # (L, D, D)
        'bo': jnp.zeros((L, 1, D), jnp.float32),
        'w1': jnp.stack(w1).astype(jnp.bfloat16),                   # (L, D, F)
        'b1': jnp.zeros((L, 1, F), jnp.float32),
        'w2': jnp.stack(w2).astype(jnp.bfloat16),                   # (L, F, D)
        'b2': jnp.zeros((L, 1, D), jnp.float32),
        'g1': jnp.ones((L, 1, D), jnp.float32),
        'be1': jnp.zeros((L, 1, D), jnp.float32),
        'g2': jnp.ones((L, 1, D), jnp.float32),
        'be2': jnp.zeros((L, 1, D), jnp.float32),
        'final_gamma': jnp.ones((1, D), jnp.float32),
        'final_beta': jnp.zeros((1, D), jnp.float32),
    }
    return params


# ----------------------------------- main ---------------------------------------

if __name__ == "__main__":
    num_layers = 2
    d_model = 32
    num_heads = 4
    d_ff = 64
    vocab_size = 100
    max_len = 64
    batch, seq_len = 2, 8

    key = jax.random.PRNGKey(0)
    k_param, k_src = jax.random.split(key)
    params = init_encoder_params(k_param, num_layers, d_model, num_heads, d_ff,
                                 vocab_size, max_len)
    src = jax.random.randint(k_src, (batch, seq_len), 0, vocab_size,
                             dtype=jnp.int32)

    fwd = jax.jit(lambda s, p: encoder_forward(s, p, num_heads))
    out = jax.block_until_ready(fwd(src, params))

    assert out.shape == (batch, seq_len, d_model)
    assert bool(jnp.all(jnp.isfinite(out)))
    print("KERNEL_OK")
</pallas_src>

<mosaic_0001>
module attributes {stable_mosaic.version = 11 : i64} {
  func.func @encoder_stack_kernel(%arg0: i32, %arg1: i32, %arg2: memref<1x8x32xbf16, #tpu.memory_space<vmem>>, %arg3: memref<1x32x96xbf16, #tpu.memory_space<vmem>>, %arg4: memref<1x1x96xf32, #tpu.memory_space<vmem>>, %arg5: memref<1x32x32xbf16, #tpu.memory_space<vmem>>, %arg6: memref<1x1x32xf32, #tpu.memory_space<vmem>>, %arg7: memref<1x32x64xbf16, #tpu.memory_space<vmem>>, %arg8: memref<1x1x64xf32, #tpu.memory_space<vmem>>, %arg9: memref<1x64x32xbf16, #tpu.memory_space<vmem>>, %arg10: memref<1x1x32xf32, #tpu.memory_space<vmem>>, %arg11: memref<1x1x32xf32, #tpu.memory_space<vmem>>, %arg12: memref<1x1x32xf32, #tpu.memory_space<vmem>>, %arg13: memref<1x1x32xf32, #tpu.memory_space<vmem>>, %arg14: memref<1x1x32xf32, #tpu.memory_space<vmem>>, %arg15: memref<1x32xf32, #tpu.memory_space<vmem>>, %arg16: memref<1x32xf32, #tpu.memory_space<vmem>>, %arg17: memref<1x8x32xf32, #tpu.memory_space<vmem>>, %arg18: memref<8x32xf32, #tpu.memory_space<vmem>>) attributes {dimension_semantics = [#tpu.dimension_semantics<parallel>, #tpu.dimension_semantics<arbitrary>], iteration_bounds = array<i64: 2, 2>, scalar_prefetch = 0 : i64, scratch_operands = 1 : i64, tpu.core_type = #tpu.core_type<tc>, window_params = [{transform_indices = @transform_0, window_bounds = array<i64: 1, 8, 32>}, {transform_indices = @transform_1, window_bounds = array<i64: 1, 32, 96>}, {transform_indices = @transform_2, window_bounds = array<i64: 1, 1, 96>}, {transform_indices = @transform_3, window_bounds = array<i64: 1, 32, 32>}, {transform_indices = @transform_4, window_bounds = array<i64: 1, 1, 32>}, {transform_indices = @transform_5, window_bounds = array<i64: 1, 32, 64>}, {transform_indices = @transform_6, window_bounds = array<i64: 1, 1, 64>}, {transform_indices = @transform_7, window_bounds = array<i64: 1, 64, 32>}, {transform_indices = @transform_8, window_bounds = array<i64: 1, 1, 32>}, {transform_indices = @transform_9, window_bounds = array<i64: 1, 1, 32>}, {transform_indices = @transform_10, window_bounds = array<i64: 1, 1, 32>}, {transform_indices = @transform_11, window_bounds = array<i64: 1, 1, 32>}, {transform_indices = @transform_12, window_bounds = array<i64: 1, 1, 32>}, {pipeline_mode = #tpu.pipeline_mode<synchronous>, transform_indices = @transform_13, window_bounds = array<i64: 1, 32>}, {pipeline_mode = #tpu.pipeline_mode<synchronous>, transform_indices = @transform_14, window_bounds = array<i64: 1, 32>}, {transform_indices = @transform_15, window_bounds = array<i64: 1, 8, 32>}]} {
    %c0_i32 = arith.constant 0 : i32
    %0 = arith.cmpi eq, %arg1, %c0_i32 : i32
    %1 = arith.extui %0 : i1 to i32
    %c0_i32_0 = arith.constant 0 : i32
    %2 = arith.cmpi ne, %1, %c0_i32_0 : i32
    scf.if %2 {
      %c0_60 = arith.constant 0 : index
      %c0_61 = arith.constant 0 : index
      %c0_62 = arith.constant 0 : index
      %151 = vector.load %arg2[%c0_60, %c0_61, %c0_62] : memref<1x8x32xbf16, #tpu.memory_space<vmem>>, vector<1x8x32xbf16>
      %152 = vector.shape_cast %151 : vector<1x8x32xbf16> to vector<8x32xbf16>
      %153 = arith.extf %152 : vector<8x32xbf16> to vector<8x32xf32>
      %c0_63 = arith.constant 0 : index
      %c0_64 = arith.constant 0 : index
      %154 = vector.load %arg18[%c0_63, %c0_64] : memref<8x32xf32, #tpu.memory_space<vmem>>, vector<8x32xf32>
      tpu.vector_store %arg18[%c0_63, %c0_64], %153 {strides = array<i32>} : memref<8x32xf32, #tpu.memory_space<vmem>>, vector<8x32xf32>,
    } else {
    }
    %c0 = arith.constant 0 : index
    %c0_1 = arith.constant 0 : index
    %3 = vector.load %arg18[%c0, %c0_1] : memref<8x32xf32, #tpu.memory_space<vmem>>, vector<8x32xf32>
    %4 = arith.truncf %3 : vector<8x32xf32> to vector<8x32xbf16>
    %c0_2 = arith.constant 0 : index
    %c0_3 = arith.constant 0 : index
    %c0_4 = arith.constant 0 : index
    %5 = vector.load %arg3[%c0_2, %c0_3, %c0_4] : memref<1x32x96xbf16, #tpu.memory_space<vmem>>, vector<1x32x96xbf16>
    %6 = vector.shape_cast %5 : vector<1x32x96xbf16> to vector<32x96xbf16>
    %cst = arith.constant dense<0.000000e+00> : vector<8x96xf32>
    %7 = tpu.matmul %4, %6, %cst {dimension_numbers = #tpu.dot_dimension_numbers<[1], [0], [0], [1], [0, 0, 1, 1], [], []>} : vector<8x32xbf16>, vector<32x96xbf16>, vector<8x96xf32> -> vector<8x96xf32>
    %c0_5 = arith.constant 0 : index
    %c0_6 = arith.constant 0 : index
    %c0_7 = arith.constant 0 : index
    %8 = vector.load %arg4[%c0_5, %c0_6, %c0_7] : memref<1x1x96xf32, #tpu.memory_space<vmem>>, vector<1x1x96xf32>
    %9 = vector.shape_cast %8 : vector<1x1x96xf32> to vector<1x96xf32>
    %10 = vector.broadcast %9 : vector<1x96xf32> to vector<8x96xf32>
    %11 = arith.addf %7, %10 : vector<8x96xf32>
    %12 = vector.extract_strided_slice %11 {offsets = [0, 0], sizes = [8, 8], strides = [1, 1]} : vector<8x96xf32> to vector<8x8xf32>
    %13 = vector.extract_strided_slice %11 {offsets = [0, 8], sizes = [8, 8], strides = [1, 1]} : vector<8x96xf32> to vector<8x8xf32>
    %14 = vector.extract_strided_slice %11 {offsets = [0, 16], sizes = [8, 8], strides = [1, 1]} : vector<8x96xf32> to vector<8x8xf32>
    %15 = vector.extract_strided_slice %11 {offsets = [0, 24], sizes = [8, 8], strides = [1, 1]} : vector<8x96xf32> to vector<8x8xf32>
    %16 = vector.extract_strided_slice %11 {offsets = [0, 32], sizes = [8, 8], strides = [1, 1]} : vector<8x96xf32> to vector<8x8xf32>
    %17 = vector.extract_strided_slice %11 {offsets = [0, 40], sizes = [8, 8], strides = [1, 1]} : vector<8x96xf32> to vector<8x8xf32>
    %18 = vector.extract_strided_slice %11 {offsets = [0, 48], sizes = [8, 8], strides = [1, 1]} : vector<8x96xf32> to vector<8x8xf32>
    %19 = vector.extract_strided_slice %11 {offsets = [0, 56], sizes = [8, 8], strides = [1, 1]} : vector<8x96xf32> to vector<8x8xf32>
    %20 = vector.extract_strided_slice %11 {offsets = [0, 64], sizes = [8, 8], strides = [1, 1]} : vector<8x96xf32> to vector<8x8xf32>
    %21 = vector.extract_strided_slice %11 {offsets = [0, 72], sizes = [8, 8], strides = [1, 1]} : vector<8x96xf32> to vector<8x8xf32>
    %22 = vector.extract_strided_slice %11 {offsets = [0, 80], sizes = [8, 8], strides = [1, 1]} : vector<8x96xf32> to vector<8x8xf32>
    %23 = vector.extract_strided_slice %11 {offsets = [0, 88], sizes = [8, 8], strides = [1, 1]} : vector<8x96xf32> to vector<8x8xf32>
    %24 = vector.shape_cast %12 : vector<8x8xf32> to vector<1x8x8xf32>
    %25 = vector.shape_cast %13 : vector<8x8xf32> to vector<1x8x8xf32>
    %26 = vector.shape_cast %14 : vector<8x8xf32> to vector<1x8x8xf32>
    %27 = vector.shape_cast %15 : vector<8x8xf32> to vector<1x8x8xf32>
    %28 = vector.shape_cast %16 : vector<8x8xf32> to vector<1x8x8xf32>
    %29 = vector.shape_cast %17 : vector<8x8xf32> to vector<1x8x8xf32>
    %30 = vector.shape_cast %18 : vector<8x8xf32> to vector<1x8x8xf32>
    %31 = vector.shape_cast %19 : vector<8x8xf32> to vector<1x8x8xf32>
    %32 = vector.shape_cast %20 : vector<8x8xf32> to vector<1x8x8xf32>
    %33 = vector.shape_cast %21 : vector<8x8xf32> to vector<1x8x8xf32>
    %34 = vector.shape_cast %22 : vector<8x8xf32> to vector<1x8x8xf32>
    %35 = vector.shape_cast %23 : vector<8x8xf32> to vector<1x8x8xf32>
    %36 = tpu.concatenate %24, %25, %26, %27, %28, %29, %30, %31, %32, %33, %34, %35 in 0 : vector<1x8x8xf32>, vector<1x8x8xf32>, vector<1x8x8xf32>, vector<1x8x8xf32>, vector<1x8x8xf32>, vector<1x8x8xf32>, vector<1x8x8xf32>, vector<1x8x8xf32>, vector<1x8x8xf32>, vector<1x8x8xf32>, vector<1x8x8xf32>, vector<1x8x8xf32> -> vector<12x8x8xf32>
    %37 = vector.extract_strided_slice %36 {offsets = [0, 0, 0], sizes = [4, 8, 8], strides = [1, 1, 1]} : vector<12x8x8xf32> to vector<4x8x8xf32>
    %cst_8 = arith.constant 0.353553385 : f32
    %38 = vector.broadcast %cst_8 : f32 to vector<4x8x8xf32>
    %39 = arith.mulf %37, %38 : vector<4x8x8xf32>
    %40 = vector.extract_strided_slice %36 {offsets = [4, 0, 0], sizes = [4, 8, 8], strides = [1, 1, 1]} : vector<12x8x8xf32> to vector<4x8x8xf32>
    %41 = vector.extract_strided_slice %36 {offsets = [8, 0, 0], sizes = [4, 8, 8], strides = [1, 1, 1]} : vector<12x8x8xf32> to vector<4x8x8xf32>
    %42 = arith.truncf %39 : vector<4x8x8xf32> to vector<4x8x8xbf16>
    %43 = arith.truncf %40 : vector<4x8x8xf32> to vector<4x8x8xbf16>
    "tpu.trace_start"() <{level = 10 : i32, message = "hqe,hke->hqk"}> : () -> ()
    %cst_9 = arith.constant dense<0.000000e+00> : vector<4x8x8xf32>
    %44 = tpu.matmul %42, %43, %cst_9 {dimension_numbers = #tpu.dot_dimension_numbers<[2], [2], [1], [1], [0, 0, 0, 1, 1, 1], [0], [0]>} : vector<4x8x8xbf16>, vector<4x8x8xbf16>, vector<4x8x8xf32> -> vector<4x8x8xf32>
    "tpu.trace_stop"() : () -> ()
    %cst_10 = arith.constant dense<0xFF800000> : vector<4x8xf32>
    %45 = vector.multi_reduction <maximumf>, %44, %cst_10 [2] : vector<4x8x8xf32> to vector<4x8xf32>
    %46 = vector.shape_cast %45 : vector<4x8xf32> to vector<4x8x1xf32>
    %47 = vector.broadcast %46 : vector<4x8x1xf32> to vector<4x8x8xf32>
    %48 = arith.subf %44, %47 : vector<4x8x8xf32>
    %49 = math.exp %48 : vector<4x8x8xf32>
    %cst_11 = arith.constant dense<0.000000e+00> : vector<4x8xf32>
    %50 = vector.multi_reduction <add>, %49, %cst_11 [2] : vector<4x8x8xf32> to vector<4x8xf32>
    %51 = vector.shape_cast %50 : vector<4x8xf32> to vector<4x8x1xf32>
    %52 = arith.truncf %49 : vector<4x8x8xf32> to vector<4x8x8xbf16>
    %53 = arith.truncf %41 : vector<4x8x8xf32> to vector<4x8x8xbf16>
    "tpu.trace_start"() <{level = 10 : i32, message = "hqk,hke->hqe"}> : () -> ()
    %cst_12 = arith.constant dense<0.000000e+00> : vector<4x8x8xf32>
    %54 = tpu.matmul %52, %53, %cst_12 {dimension_numbers = #tpu.dot_dimension_numbers<[2], [1], [1], [2], [0, 0, 0, 1, 1, 2], [0], [0]>} : vector<4x8x8xbf16>, vector<4x8x8xbf16>, vector<4x8x8xf32> -> vector<4x8x8xf32>
    "tpu.trace_stop"() : () -> ()
    %55 = tpu.reciprocal %51 {approx = true} : vector<4x8x1xf32> -> vector<4x8x1xf32>
    %56 = vector.broadcast %55 : vector<4x8x1xf32> to vector<4x8x8xf32>
    %57 = arith.mulf %54, %56 : vector<4x8x8xf32>
    %58 = vector.extract_strided_slice %57 {offsets = [0, 0, 0], sizes = [1, 8, 8], strides = [1, 1, 1]} : vector<4x8x8xf32> to vector<1x8x8xf32>
    %59 = vector.shape_cast %58 : vector<1x8x8xf32> to vector<8x8xf32>
    %60 = vector.extract_strided_slice %57 {offsets = [1, 0, 0], sizes = [1, 8, 8], strides = [1, 1, 1]} : vector<4x8x8xf32> to vector<1x8x8xf32>
    %61 = vector.shape_cast %60 : vector<1x8x8xf32> to vector<8x8xf32>
    %62 = vector.extract_strided_slice %57 {offsets = [2, 0, 0], sizes = [1, 8, 8], strides = [1, 1, 1]} : vector<4x8x8xf32> to vector<1x8x8xf32>
    %63 = vector.shape_cast %62 : vector<1x8x8xf32> to vector<8x8xf32>
    %64 = vector.extract_strided_slice %57 {offsets = [3, 0, 0], sizes = [1, 8, 8], strides = [1, 1, 1]} : vector<4x8x8xf32> to vector<1x8x8xf32>
    %65 = vector.shape_cast %64 : vector<1x8x8xf32> to vector<8x8xf32>
    %66 = tpu.concatenate %59, %61, %63, %65 in 1 : vector<8x8xf32>, vector<8x8xf32>, vector<8x8xf32>, vector<8x8xf32> -> vector<8x32xf32>
    %67 = arith.truncf %66 : vector<8x32xf32> to vector<8x32xbf16>
    %c0_13 = arith.constant 0 : index
    %c0_14 = arith.constant 0 : index
    %c0_15 = arith.constant 0 : index
    %68 = vector.load %arg5[%c0_13, %c0_14, %c0_15] : memref<1x32x32xbf16, #tpu.memory_space<vmem>>, vector<1x32x32xbf16>
    %69 = vector.shape_cast %68 : vector<1x32x32xbf16> to vector<32x32xbf16>
    %cst_16 = arith.constant dense<0.000000e+00> : vector<8x32xf32>
    %70 = tpu.matmul %67, %69, %cst_16 {dimension_numbers = #tpu.dot_dimension_numbers<[1], [0], [0], [1], [0, 0, 1, 1], [], []>} : vector<8x32xbf16>, vector<32x32xbf16>, vector<8x32xf32> -> vector<8x32xf32>
    %c0_17 = arith.constant 0 : index
    %c0_18 = arith.constant 0 : index
    %c0_19 = arith.constant 0 : index
    %71 = vector.load %arg6[%c0_17, %c0_18, %c0_19] : memref<1x1x32xf32, #tpu.memory_space<vmem>>, vector<1x1x32xf32>
    %72 = vector.shape_cast %71 : vector<1x1x32xf32> to vector<1x32xf32>
    %73 = vector.broadcast %72 : vector<1x32xf32> to vector<8x32xf32>
    %74 = arith.addf %70, %73 : vector<8x32xf32>
    %75 = arith.addf %3, %74 : vector<8x32xf32>
    %c0_20 = arith.constant 0 : index
    %c0_21 = arith.constant 0 : index
    %c0_22 = arith.constant 0 : index
    %76 = vector.load %arg11[%c0_20, %c0_21, %c0_22] : memref<1x1x32xf32, #tpu.memory_space<vmem>>, vector<1x1x32xf32>
    %77 = vector.shape_cast %76 : vector<1x1x32xf32> to vector<1x32xf32>
    %c0_23 = arith.constant 0 : index
    %c0_24 = arith.constant 0 : index
    %c0_25 = arith.constant 0 : index
    %78 = vector.load %arg12[%c0_23, %c0_24, %c0_25] : memref<1x1x32xf32, #tpu.memory_space<vmem>>, vector<1x1x32xf32>
    %79 = vector.shape_cast %78 : vector<1x1x32xf32> to vector<1x32xf32>
    %cst_26 = arith.constant dense<0.000000e+00> : vector<8xf32>
    %80 = vector.multi_reduction <add>, %75, %cst_26 [1] : vector<8x32xf32> to vector<8xf32>
    %81 = vector.shape_cast %80 : vector<8xf32> to vector<8x1xf32>
    %cst_27 = arith.constant 3.200000e+01 : f32
    %82 = vector.broadcast %cst_27 : f32 to vector<8x1xf32>
    %83 = arith.divf %81, %82 : vector<8x1xf32>
    %84 = vector.broadcast %83 : vector<8x1xf32> to vector<8x32xf32>
    %85 = arith.subf %75, %84 : vector<8x32xf32>
    %86 = arith.mulf %85, %85 : vector<8x32xf32>
    %cst_28 = arith.constant dense<0.000000e+00> : vector<8xf32>
    %87 = vector.multi_reduction <add>, %86, %cst_28 [1] : vector<8x32xf32> to vector<8xf32>
    %88 = vector.shape_cast %87 : vector<8xf32> to vector<8x1xf32>
    %cst_29 = arith.constant 3.200000e+01 : f32
    %89 = vector.broadcast %cst_29 : f32 to vector<8x1xf32>
    %90 = arith.divf %88, %89 : vector<8x1xf32>
    %91 = vector.broadcast %83 : vector<8x1xf32> to vector<8x32xf32>
    %92 = arith.subf %75, %91 : vector<8x32xf32>
    %cst_30 = arith.constant 9.99999974E-6 : f32
    %93 = vector.broadcast %cst_30 : f32 to vector<8x1xf32>
    %94 = arith.addf %90, %93 : vector<8x1xf32>
    %95 = math.rsqrt %94 : vector<8x1xf32>
    %96 = vector.broadcast %95 : vector<8x1xf32> to vector<8x32xf32>
    %97 = arith.mulf %92, %96 : vector<8x32xf32>
    %98 = vector.broadcast %77 : vector<1x32xf32> to vector<8x32xf32>
    %99 = arith.mulf %97, %98 : vector<8x32xf32>
    %100 = vector.broadcast %79 : vector<1x32xf32> to vector<8x32xf32>
    %101 = arith.addf %99, %100 : vector<8x32xf32>
    %102 = arith.truncf %101 : vector<8x32xf32> to vector<8x32xbf16>
    %c0_31 = arith.constant 0 : index
    %c0_32 = arith.constant 0 : index
    %c0_33 = arith.constant 0 : index
    %103 = vector.load %arg7[%c0_31, %c0_32, %c0_33] : memref<1x32x64xbf16, #tpu.memory_space<vmem>>, vector<1x32x64xbf16>
    %104 = vector.shape_cast %103 : vector<1x32x64xbf16> to vector<32x64xbf16>
    %cst_34 = arith.constant dense<0.000000e+00> : vector<8x64xf32>
    %105 = tpu.matmul %102, %104, %cst_34 {dimension_numbers = #tpu.dot_dimension_numbers<[1], [0], [0], [1], [0, 0, 1, 1], [], []>} : vector<8x32xbf16>, vector<32x64xbf16>, vector<8x64xf32> -> vector<8x64xf32>
    %c0_35 = arith.constant 0 : index
    %c0_36 = arith.constant 0 : index
    %c0_37 = arith.constant 0 : index
    %106 = vector.load %arg8[%c0_35, %c0_36, %c0_37] : memref<1x1x64xf32, #tpu.memory_space<vmem>>, vector<1x1x64xf32>
    %107 = vector.shape_cast %106 : vector<1x1x64xf32> to vector<1x64xf32>
    %108 = vector.broadcast %107 : vector<1x64xf32> to vector<8x64xf32>
    %109 = arith.addf %105, %108 : vector<8x64xf32>
    %cst_38 = arith.constant 0.000000e+00 : f32
    %110 = vector.broadcast %cst_38 : f32 to vector<8x64xf32>
    %111 = arith.maximumf %109, %110 : vector<8x64xf32>
    %112 = arith.truncf %111 : vector<8x64xf32> to vector<8x64xbf16>
    %c0_39 = arith.constant 0 : index
    %c0_40 = arith.constant 0 : index
    %c0_41 = arith.constant 0 : index
    %113 = vector.load %arg9[%c0_39, %c0_40, %c0_41] : memref<1x64x32xbf16, #tpu.memory_space<vmem>>, vector<1x64x32xbf16>
    %114 = vector.shape_cast %113 : vector<1x64x32xbf16> to vector<64x32xbf16>
    %cst_42 = arith.constant dense<0.000000e+00> : vector<8x32xf32>
    %115 = tpu.matmul %112, %114, %cst_42 {dimension_numbers = #tpu.dot_dimension_numbers<[1], [0], [0], [1], [0, 0, 1, 1], [], []>} : vector<8x64xbf16>, vector<64x32xbf16>, vector<8x32xf32> -> vector<8x32xf32>
    %c0_43 = arith.constant 0 : index
    %c0_44 = arith.constant 0 : index
    %c0_45 = arith.constant 0 : index
    %116 = vector.load %arg10[%c0_43, %c0_44, %c0_45] : memref<1x1x32xf32, #tpu.memory_space<vmem>>, vector<1x1x32xf32>
    %117 = vector.shape_cast %116 : vector<1x1x32xf32> to vector<1x32xf32>
    %118 = vector.broadcast %117 : vector<1x32xf32> to vector<8x32xf32>
    %119 = arith.addf %115, %118 : vector<8x32xf32>
    %120 = arith.addf %101, %119 : vector<8x32xf32>
    %c0_46 = arith.constant 0 : index
    %c0_47 = arith.constant 0 : index
    %c0_48 = arith.constant 0 : index
    %121 = vector.load %arg13[%c0_46, %c0_47, %c0_48] : memref<1x1x32xf32, #tpu.memory_space<vmem>>, vector<1x1x32xf32>
    %122 = vector.shape_cast %121 : vector<1x1x32xf32> to vector<1x32xf32>
    %c0_49 = arith.constant 0 : index
    %c0_50 = arith.constant 0 : index
    %c0_51 = arith.constant 0 : index
    %123 = vector.load %arg14[%c0_49, %c0_50, %c0_51] : memref<1x1x32xf32, #tpu.memory_space<vmem>>, vector<1x1x32xf32>
    %124 = vector.shape_cast %123 : vector<1x1x32xf32> to vector<1x32xf32>
    %cst_52 = arith.constant dense<0.000000e+00> : vector<8xf32>
    %125 = vector.multi_reduction <add>, %120, %cst_52 [1] : vector<8x32xf32> to vector<8xf32>
    %126 = vector.shape_cast %125 : vector<8xf32> to vector<8x1xf32>
    %cst_53 = arith.constant 3.200000e+01 : f32
    %127 = vector.broadcast %cst_53 : f32 to vector<8x1xf32>
    %128 = arith.divf %126, %127 : vector<8x1xf32>
    %129 = vector.broadcast %128 : vector<8x1xf32> to vector<8x32xf32>
    %130 = arith.subf %120, %129 : vector<8x32xf32>
    %131 = arith.mulf %130, %130 : vector<8x32xf32>
    %cst_54 = arith.constant dense<0.000000e+00> : vector<8xf32>
    %132 = vector.multi_reduction <add>, %131, %cst_54 [1] : vector<8x32xf32> to vector<8xf32>
    %133 = vector.shape_cast %132 : vector<8xf32> to vector<8x1xf32>
    %cst_55 = arith.constant 3.200000e+01 : f32
    %134 = vector.broadcast %cst_55 : f32 to vector<8x1xf32>
    %135 = arith.divf %133, %134 : vector<8x1xf32>
    %136 = vector.broadcast %128 : vector<8x1xf32> to vector<8x32xf32>
    %137 = arith.subf %120, %136 : vector<8x32xf32>
    %cst_56 = arith.constant 9.99999974E-6 : f32
    %138 = vector.broadcast %cst_56 : f32 to vector<8x1xf32>
    %139 = arith.addf %135, %138 : vector<8x1xf32>
    %140 = math.rsqrt %139 : vector<8x1xf32>
    %141 = vector.broadcast %140 : vector<8x1xf32> to vector<8x32xf32>
    %142 = arith.mulf %137, %141 : vector<8x32xf32>
    %143 = vector.broadcast %122 : vector<1x32xf32> to vector<8x32xf32>
    %144 = arith.mulf %142, %143 : vector<8x32xf32>
    %145 = vector.broadcast %124 : vector<1x32xf32> to vector<8x32xf32>
    %146 = arith.addf %144, %145 : vector<8x32xf32>
    %c0_57 = arith.constant 0 : index
    %c0_58 = arith.constant 0 : index
    %147 = vector.load %arg18[%c0_57, %c0_58] : memref<8x32xf32, #tpu.memory_space<vmem>>, vector<8x32xf32>
    tpu.vector_store %arg18[%c0_57, %c0_58], %146 {strides = array<i32>} : memref<8x32xf32, #tpu.memory_space<vmem>>, vector<8x32xf32>,
    %c1_i32 = arith.constant 1 : i32
    %148 = arith.cmpi eq, %arg1, %c1_i32 : i32
    %149 = arith.extui %148 : i1 to i32
    %c0_i32_59 = arith.constant 0 : i32
    %150 = arith.cmpi ne, %149, %c0_i32_59 : i32
    scf.if %150 {
      %c0_60 = arith.constant 0 : index
      %c0_61 = arith.constant 0 : index
      %151 = vector.load %arg15[%c0_60, %c0_61] : memref<1x32xf32, #tpu.memory_space<vmem>>, vector<1x32xf32>
      %c0_62 = arith.constant 0 : index
      %c0_63 = arith.constant 0 : index
      %152 = vector.load %arg16[%c0_62, %c0_63] : memref<1x32xf32, #tpu.memory_space<vmem>>, vector<1x32xf32>
      %cst_64 = arith.constant dense<0.000000e+00> : vector<8xf32>
      %153 = vector.multi_reduction <add>, %146, %cst_64 [1] : vector<8x32xf32> to vector<8xf32>
      %154 = vector.shape_cast %153 : vector<8xf32> to vector<8x1xf32>
      %cst_65 = arith.constant 3.200000e+01 : f32
      %155 = vector.broadcast %cst_65 : f32 to vector<8x1xf32>
      %156 = arith.divf %154, %155 : vector<8x1xf32>
      %157 = vector.broadcast %156 : vector<8x1xf32> to vector<8x32xf32>
      %158 = arith.subf %146, %157 : vector<8x32xf32>
      %159 = arith.mulf %158, %158 : vector<8x32xf32>
      %cst_66 = arith.constant dense<0.000000e+00> : vector<8xf32>
      %160 = vector.multi_reduction <add>, %159, %cst_66 [1] : vector<8x32xf32> to vector<8xf32>
      %161 = vector.shape_cast %160 : vector<8xf32> to vector<8x1xf32>
      %cst_67 = arith.constant 3.200000e+01 : f32
      %162 = vector.broadcast %cst_67 : f32 to vector<8x1xf32>
      %163 = arith.divf %161, %162 : vector<8x1xf32>
      %164 = vector.broadcast %156 : vector<8x1xf32> to vector<8x32xf32>
      %165 = arith.subf %146, %164 : vector<8x32xf32>
      %cst_68 = arith.constant 9.99999974E-6 : f32
      %166 = vector.broadcast %cst_68 : f32 to vector<8x1xf32>
      %167 = arith.addf %163, %166 : vector<8x1xf32>
      %168 = math.rsqrt %167 : vector<8x1xf32>
      %169 = vector.broadcast %168 : vector<8x1xf32> to vector<8x32xf32>
      %170 = arith.mulf %165, %169 : vector<8x32xf32>
      %171 = vector.broadcast %151 : vector<1x32xf32> to vector<8x32xf32>
      %172 = arith.mulf %170, %171 : vector<8x32xf32>
      %173 = vector.broadcast %152 : vector<1x32xf32> to vector<8x32xf32>
      %174 = arith.addf %172, %173 : vector<8x32xf32>
      %c0_69 = arith.constant 0 : index
      %c0_70 = arith.constant 0 : index
      %c0_71 = arith.constant 0 : index
      %175 = vector.load %arg17[%c0_69, %c0_70, %c0_71] : memref<1x8x32xf32, #tpu.memory_space<vmem>>, vector<1x8x32xf32>
      %176 = vector.shape_cast %175 : vector<1x8x32xf32> to vector<8x32xf32>
      %177 = vector.shape_cast %174 : vector<8x32xf32> to vector<1x8x32xf32>
      tpu.vector_store %arg17[%c0_69, %c0_70, %c0_71], %177 {strides = array<i32>} : memref<1x8x32xf32, #tpu.memory_space<vmem>>, vector<1x8x32xf32>,
    } else {
    }
    return
  }
  func.func @transform_0(%arg0: i32, %arg1: i32) -> (i32, i32, i32) {
    %c0_i32 = arith.constant 0 : i32
    %c0_i32_0 = arith.constant 0 : i32
    %c0_i32_1 = arith.constant 0 : i32
    return %arg0, %c0_i32, %c0_i32_0 : i32, i32, i32
  }
  func.func @transform_1(%arg0: i32, %arg1: i32) -> (i32, i32, i32) {
    %c0_i32 = arith.constant 0 : i32
    %c0_i32_0 = arith.constant 0 : i32
    %c0_i32_1 = arith.constant 0 : i32
    return %arg1, %c0_i32, %c0_i32_0 : i32, i32, i32
  }
  func.func @transform_2(%arg0: i32, %arg1: i32) -> (i32, i32, i32) {
    %c0_i32 = arith.constant 0 : i32
    %c0_i32_0 = arith.constant 0 : i32
    %c0_i32_1 = arith.constant 0 : i32
    return %arg1, %c0_i32, %c0_i32_0 : i32, i32, i32
  }
  func.func @transform_3(%arg0: i32, %arg1: i32) -> (i32, i32, i32) {
    %c0_i32 = arith.constant 0 : i32
    %c0_i32_0 = arith.constant 0 : i32
    %c0_i32_1 = arith.constant 0 : i32
    return %arg1, %c0_i32, %c0_i32_0 : i32, i32, i32
  }
  func.func @transform_4(%arg0: i32, %arg1: i32) -> (i32, i32, i32) {
    %c0_i32 = arith.constant 0 : i32
    %c0_i32_0 = arith.constant 0 : i32
    %c0_i32_1 = arith.constant 0 : i32
    return %arg1, %c0_i32, %c0_i32_0 : i32, i32, i32
  }
  func.func @transform_5(%arg0: i32, %arg1: i32) -> (i32, i32, i32) {
    %c0_i32 = arith.constant 0 : i32
    %c0_i32_0 = arith.constant 0 : i32
    %c0_i32_1 = arith.constant 0 : i32
    return %arg1, %c0_i32, %c0_i32_0 : i32, i32, i32
  }
  func.func @transform_6(%arg0: i32, %arg1: i32) -> (i32, i32, i32) {
    %c0_i32 = arith.constant 0 : i32
    %c0_i32_0 = arith.constant 0 : i32
    %c0_i32_1 = arith.constant 0 : i32
    return %arg1, %c0_i32, %c0_i32_0 : i32, i32, i32
  }
  func.func @transform_7(%arg0: i32, %arg1: i32) -> (i32, i32, i32) {
    %c0_i32 = arith.constant 0 : i32
    %c0_i32_0 = arith.constant 0 : i32
    %c0_i32_1 = arith.constant 0 : i32
    return %arg1, %c0_i32, %c0_i32_0 : i32, i32, i32
  }
  func.func @transform_8(%arg0: i32, %arg1: i32) -> (i32, i32, i32) {
    %c0_i32 = arith.constant 0 : i32
    %c0_i32_0 = arith.constant 0 : i32
    %c0_i32_1 = arith.constant 0 : i32
    return %arg1, %c0_i32, %c0_i32_0 : i32, i32, i32
  }
  func.func @transform_9(%arg0: i32, %arg1: i32) -> (i32, i32, i32) {
    %c0_i32 = arith.constant 0 : i32
    %c0_i32_0 = arith.constant 0 : i32
    %c0_i32_1 = arith.constant 0 : i32
    return %arg1, %c0_i32, %c0_i32_0 : i32, i32, i32
  }
  func.func @transform_10(%arg0: i32, %arg1: i32) -> (i32, i32, i32) {
    %c0_i32 = arith.constant 0 : i32
    %c0_i32_0 = arith.constant 0 : i32
    %c0_i32_1 = arith.constant 0 : i32
    return %arg1, %c0_i32, %c0_i32_0 : i32, i32, i32
  }
  func.func @transform_11(%arg0: i32, %arg1: i32) -> (i32, i32, i32) {
    %c0_i32 = arith.constant 0 : i32
    %c0_i32_0 = arith.constant 0 : i32
    %c0_i32_1 = arith.constant 0 : i32
    return %arg1, %c0_i32, %c0_i32_0 : i32, i32, i32
  }
  func.func @transform_12(%arg0: i32, %arg1: i32) -> (i32, i32, i32) {
    %c0_i32 = arith.constant 0 : i32
    %c0_i32_0 = arith.constant 0 : i32
    %c0_i32_1 = arith.constant 0 : i32
    return %arg1, %c0_i32, %c0_i32_0 : i32, i32, i32
  }
  func.func @transform_13(%arg0: i32, %arg1: i32) -> (i32, i32) {
    %c0_i32 = arith.constant 0 : i32
    %c0_i32_0 = arith.constant 0 : i32
    %c0_i32_1 = arith.constant 0 : i32
    return %c0_i32, %c0_i32_0 : i32, i32
  }
  func.func @transform_14(%arg0: i32, %arg1: i32) -> (i32, i32) {
    %c0_i32 = arith.constant 0 : i32
    %c0_i32_0 = arith.constant 0 : i32
    %c0_i32_1 = arith.constant 0 : i32
    return %c0_i32, %c0_i32_0 : i32, i32
  }
  func.func @transform_15(%arg0: i32, %arg1: i32) -> (i32, i32, i32) {
    %c0_i32 = arith.constant 0 : i32
    %c0_i32_0 = arith.constant 0 : i32
    %c0_i32_1 = arith.constant 0 : i32
    return %arg0, %c0_i32, %c0_i32_0 : i32, i32, i32
  }
}

</mosaic_0001>

<bundles_post_ra>
// kernel: _lambda_.1
= control target key start
LH: loop header
LB: loop body
LE: loop exit
PB: predicated region body
PF: predicated region fallthrough
CT: control target
= control target key end

     0   :  { %s2605_s0 = inlined_call_operand.vmem [shape: bf16[2,8,32], index: 0, kind: input, shape index: {}]   ;;  %s2606_s1 = inlined_call_operand.vmem [shape: bf16[2,32,96], index: 1, kind: input, shape index: {}]   ;;  %s2607_s2 = inlined_call_operand.vmem [shape: f32[2,1,96], index: 2, kind: input, shape index: {}]   ;;  %s2608_s3 = inlined_call_operand.vmem [shape: bf16[2,32,32], index: 3, kind: input, shape index: {}]   ;;  %s2609_s4 = inlined_call_operand.vmem [shape: f32[2,1,32], index: 4, kind: input, shape index: {}]   ;;  %s2610_s5 = inlined_call_operand.vmem [shape: bf16[2,32,64], index: 5, kind: input, shape index: {}]   ;;  %s2611_s6 = inlined_call_operand.vmem [shape: f32[2,1,64], index: 6, kind: input, shape index: {}]   ;;  %s2612_s7 = inlined_call_operand.vmem [shape: bf16[2,64,32], index: 7, kind: input, shape index: {}]   ;;  %s2613_s8 = inlined_call_operand.vmem [shape: f32[2,1,32], index: 8, kind: input, shape index: {}]   ;;  %s2614_s9 = inlined_call_operand.vmem [shape: f32[2,1,32], index: 9, kind: input, shape index: {}]   ;;  %s2615_s10 = inlined_call_operand.vmem [shape: f32[2,1,32], index: 10, kind: input, shape index: {}]   ;;  %s2616_s11 = inlined_call_operand.vmem [shape: f32[2,1,32], index: 11, kind: input, shape index: {}]   ;;  %s2617_s12 = inlined_call_operand.vmem [shape: f32[2,1,32], index: 12, kind: input, shape index: {}]   ;;  %s2618_s13 = inlined_call_operand.vmem [shape: f32[1,32], index: 13, kind: input, shape index: {}]   ;;  %s2619_s14 = inlined_call_operand.vmem [shape: f32[1,32], index: 14, kind: input, shape index: {}]   ;;  %s2620_s15 = inlined_call_operand.hbm [shape: f32[2,8,32], index: 15, kind: output, shape index: {}]  }
   0x1   :  { %2637 = sst [smem:[#allocation20_spill]] %s2605_s0 }
   0x2   :  { %2638 = sst [smem:[#allocation21_spill]] %s2606_s1 }
   0x3   :  { %2639 = sst [smem:[#allocation22_spill]] %s2608_s3 }
   0x4   :  { %2640 = sst [smem:[#allocation23_spill]] %s2610_s5 }
   0x5   :  { %2641 = sst [smem:[#allocation24_spill]] %s2618_s13 }
   0x6   :  { %2642 = sst [smem:[#allocation25_spill]] %s2619_s14 }
   0x7   :  { %2643 = sst [smem:[#allocation26_spill]] %s2620_s15 }
   0x8   :  { %20 = vsyncpa [#allocation4], 0 }
   0x9   :  { %22 = vsyncpa [#allocation4 + $0x1], 0  ;;  %s2259_s18 = smov 0   ;;  %s2261_s19 = smov 0  }
   0xa   :  { %s2263_s20 = smov 0   ;;  %s2265_s21 = smov 0  }
   0xb   :  { %s2267_s22 = smov 0   ;;  %s2269_s23 = smov 0  }
   0xc   :  { %s2271_s24 = smov 0   ;;  %s2273_s25 = smov 0  }
   0xd LB: > { %2644 = sst [smem:[#allocation6_spill]] %s2132_s18  ;;  %s1776_s26 = sadd.s32 4294967295, %s2160_s25   ;;  %s2160_s25 = sphi %s2273_s25, %s28_s25   ;;  %s2156_s24 = sphi %s2271_s24, %s2687_s24   ;;  %s2152_s23 = sphi %s2269_s23, %s2686_s23   ;;  %s2148_s22 = sphi %s2267_s22, %s2685_s22   ;;  %s2144_s21 = sphi %s2265_s21, %s2684_s21   ;;  %s2140_s20 = sphi %s2263_s20, %s2683_s20   ;;  %s2136_s19 = sphi %s2261_s19, %s2682_s19   ;;  %s2132_s18 = sphi %s2259_s18, %s2681_s18  }
   0xe   : > { %2645 = sst [smem:[#allocation7_spill]] %s2136_s19  ;;  %s1777_s27 = sadd.s32 4294967294, %s2160_s25  }
   0xf   : > { %2646 = sst [smem:[#allocation8_spill]] %s2140_s20  ;;  %s37_s28 = sadd.s32 1, %s2152_s23 }
  0x10   : > { %2647 = sst [smem:[#allocation9_spill]] %s2144_s21  ;;  %p38_p0 = scmp.ge.s32.totalorder %s37_s28, 2 }
  0x11   : > { %2648 = sst [smem:[#allocation10_spill]] %s2148_s22  ;;  %s40_s29 = sadd.s32 1, %s2156_s24 }
  0x12   : > { %2649 = sst [smem:[#allocation11_spill]] %s2152_s23  ;;  %p437_p1 = scmp.ne.s32.totalorder %s2140_s20, %s2136_s19 }
  0x13   : > { %2650 = sst [smem:[#allocation12_spill]] %s2156_s24  ;;  %p438_p2 = scmp.eq.s32.totalorder %s1776_s26, 3 }
  0x14   : > { %2651 = sst [smem:[#allocation13_spill]] %s2160_s25  ;;  %s2689_s28 = smov (%p38_p0, %s37_s28), 0 }
  0x15   : > { %2652 = sst [smem:[#allocation14_spill]] %s2689_s28  ;;  %s2691_s29 = smov (!%p38_p0, %s40_s29), %s2156_s24 }
  0x16   : > { %p2308_p3 = por %p438_p2, %p437_p1  ;;  %p443_p4 = scmp.ne.s32.totalorder %s2136_s19, %s2132_s18 }
  0x17   : > { %p42_p5 = scmp.ge.s32.totalorder %s2691_s29, 2  ;;  %p444_p6 = scmp.eq.s32.totalorder %s1777_s27, 3 }
  0x18   : > { %s2653_s30 = scalar_select %p2308_p3, 1, 0 }
  0x19   : > { %p1780_p7 = scmp.ge.s32.totalorder %s2160_s25, 1  ;;  %p555_p8 = scmp.lt.s32.totalorder %s2160_s25, 5 }
  0x1a   : > { %2654 = sst [smem:[#allocation15_spill]] %s2653_s30  ;;  %s2693_s29 = smov (%p42_p5, %s2691_s29), 0 }
  0x1b   : > { %2655 = sst [smem:[#allocation16_spill]] %s2693_s29  ;;  %p2318_p9 = por %p444_p6, %p443_p4 }
  0x1c   : > { %p556_p10 = pnand %p1780_p7, %p555_p8  ;;  %s424_s17 = ssub.s32 %s2156_s24, %s2693_s29 }
  0x1d   : > { %s2656_s16 = scalar_select %p2318_p9, 1, 0 }
  0x1e   : > { %s427_s26 = sadd.s32 1, %s2140_s20  ;;  %p425_p11 = scmp.eq.s32.totalorder %s424_s17, 0 }
  0x1f   : > { %2657 = sst [smem:[#allocation17_spill]] %s2656_s16  ;;  %559 = sbr.rel (%p556_p10) target bundleno = 2748 (0xabc), region = 80 }
  0x20   : > { %s2326_s28 = scalar_select %p425_p11, %s2140_s20, %s427_s26  }
  0x22   : > { %2658 = sst [smem:[#allocation18_spill]] %s2326_s28 }
  0x26   : > { %s2625_s27 = sand.u32 1, %s2136_s19   ;;  %p646_p12 = scmp.lt.s32.totalorder %s2148_s22, 1 }
  0x27   : > { %s2332_s23 = sshll.u32 %s2625_s27, 3  ;;  %p650_p13 = scmp.lt.s32.totalorder %s2144_s21, 1 }
  0x28   : > { %s647_s16 = scalar_select %p646_p12, %s2148_s22, 1 }
  0x29   : > { %s2337_s18 = scalar_select %p650_p13, %s2144_s21, 1 }
  0x2a   : > { %s1782_s17 = sshll.u32 %s647_s16, 2  ;;  %s2659_s0 = sld [smem:[#allocation20_spill]] }
  0x2b   : > { %s1829_s24 = sshll.u32 %s2337_s18, 4  ;;  %s2660_s1 = sld [smem:[#allocation21_spill]] }
  0x2c   : > { %s2661_s3 = sld [smem:[#allocation22_spill]]  ;;  %s2663_s5 = sld [smem:[#allocation23_spill]] }
  0x2d   : > { %s1832_s15 = sshll.u32 %s2337_s18, 5  ;;  %s684_s26 = scalar_lea.vmem %s2614_s9, %s2337_s18 }
  0x2e   : > { %s687_s29 = scalar_lea.vmem %s2615_s10, %s2337_s18  ;;  %s693_s30 = scalar_lea.vmem %s2617_s12, %s2337_s18 }
  0x2f   : > { %s645_s14 = scalar_lea.vmem [#allocation3], %s2332_s23 }
  0x30   : > { %s649_s27 = scalar_lea.vmem %s2659_s0, %s1782_s17 }
  0x31   : > { %s654_s25 = scalar_lea.vmem %s2660_s1, %s1829_s24  ;;  %s690_s1 = scalar_lea.vmem %s2616_s11, %s2337_s18 }
  0x32   : > { %s2353_s13 = scalar_lea.vmem %s2661_s3, %s1829_s24  ;;  %s2362_s0 = scalar_lea.vmem %s2663_s5, %s1829_s24 }
  0x33   : > { %2662 = sst [smem:[#allocation19_spill]] %s2353_s13  ;;  %s2376_s13 = scalar_lea.vmem %s2612_s7, %s1832_s15 }
  0x34   : > { %s2664_s3 = sld [smem:[#allocation9_spill]] }
  0x3a   : > { %p1791_p0 = scmp.ne.s32.totalorder %s2664_s3, 0 }
  0x3b   : > { %v699_v0 = vld [vmem:[%s649_s27] sm:$0xf] (!%p1791_p0)  ;;  %vm701_vm0 = vcmask (!%p1791_p0), 261120  }
  0x3c   : > { %698 = sbr.rel (%p1791_p0) target bundleno = 67 (0x43), region = 84  ;;  %v700_v1 = vunpack.c.l.bf16 (!%p1791_p0), %v699_v0 }
  0x3e   : > { %702 = vst.msk [vmem:[#allocation2] sm:$0xff] (!%p1791_p0), %vm701_vm0, %v700_v1 }
  0x43 PF: > { %v2034_v2 = vld [vmem:[%s654_s25] sm:$0xff]   ;;  %v2162_v3 = vmov 0.0   ;;  %v2035_v4 = vld [vmem:[%s654_s25 + $0x8] sm:$0xff]   ;;  %vm2163_vm1 = vmmov 0   ;;  %vm728_vm2 = vcmask 261120   ;;  %s2665_s27 = scalar_lea.vmem %s2607_s2, %s2337_s18  ;;  %s2164_s15 = smov 120  }
  0x44   : > { %1863 = vmatprep.subr.bf16.mxu0 %v2162_v3  ;;  %1871 = vmatprep.subr.bf16.mxu1 %v2162_v3  ;;  %v1792_v7 = vld [vmem:[%s2665_s27] ss:$0 sm:$0xff]  ;;  %s2165_s22 = smov 96   ;;  %s2166_s21 = smov 80   ;;  %vm818_vm3 = vcmask 64512   ;;  %vm1050_vm4 = vcmask 1043456  }
  0x45   : > { %1864 = vmatpush3.bf16.msra.mxu0 %v2034_v2  ;;  %1867 = vmatprep.mubr.msk.bf16.mxu0 %vm2163_vm1, %v2162_v3  ;;  %v2400_v5 = vld [vmem:[#allocation2] sm:$0xff]  ;;  %s2167_s16 = smov 88   ;;  %s2168_s24 = smov 112   ;;  %vm1253_vm5 = vcmask 130048   ;;  %vm1255_vm6 = vcmask 195584   ;;  %vm1463_vm7 = vcmask 523264  }
  0x46   : > { %1865 = vmatprep.subr.bf16.mxu0 %v2162_v3  ;;  %1873 = vmatprep.mubr.msk.bf16.mxu1 %vm2163_vm1, %v2162_v3  ;;  %v704_v6 = vpack.c.bf16 %v2400_v5, %v2400_v5  ;;  %s2169_s17 = smov 72   ;;  %s2170_s20 = smov 56  }
  0x47   : > { %s2171_s28 = smov 104   ;;  %s2172_s19 = smov 64  }
  0x48   : > { %s2173_s3 = smov 48   ;;  %s2174_s5 = smov 40  }
  0x49   : > { %1866 = vmatpush3.bf16.msra.mxu0 %v2035_v4  ;;  %s2666_s25 = sld [smem:[#allocation19_spill]]  ;;  %s2175_s27 = smov 8  }
  0x4a   : > { %1877 = vmatprep.subr.bf16.mxu0 %v2162_v3 }
  0x4c   : > { %1868 = vmatmul.mubr.msk.bf16.vlgmr.msra.gmra.mrb[0].mxu0 %vm728_vm2, %v704_v6 }
  0x4d   : > { %1879 = vmatprep.mubr.msk.bf16.mxu0 %vm2163_vm1, %v2162_v3 }
 0x11f   : > { %v766_v8 = vpop.f32.mrb[0].mxu0 }
 0x120   : > { %v2416_v9 = vadd.f32 %v1792_v7, %v766_v8  ;;  %v1869_v10 = vpop.f32.mrb[1].mxu0 }
 0x121   : > { %v769_v11 = vpop.f32.mrb[2].mxu0 }
 0x122   : > { %773 = vrot.lane.b32.xlu1 %v2416_v9, %s2164_s15  ;;  %782 = vrot.lane.b32.xlu0 %v2416_v9, %s2165_s22  ;;  %v1870_v12 = vpop.f32.mrb[3].mxu0  ;;  %v806_v20 = vmul.f32 0.35355338, %v2416_v9  ;;  %s2176_s15 = smov 16   ;;  %s2177_s22 = smov 24  }
 0x124   : > { %v810_v25 = vpack.c.bf16 %v806_v20, %v806_v20 }
 0x126   : > { %788 = vrot.lane.b32.xlu1 %v2416_v9, %s2166_s21  ;;  %785 = vrot.lane.b32.xlu0 %v2416_v9, %s2167_s16  ;;  %s2670_s21 = sld [smem:[#allocation9_spill]] }
 0x12a   : > { %776 = vrot.lane.b32.xlu1 %v2416_v9, %s2168_s24  ;;  %791 = vrot.lane.b32.xlu0 %v2416_v9, %s2169_s17  ;;  %s2667_s24 = scalar_lea.vmem %s2609_s4, %s2337_s18 }
 0x12c   : > { %p1822_p1 = scmp.ne.s32.totalorder %s2670_s21, 1 }
 0x12e   : > { %797 = vrot.lane.b32.xlu1 %v2416_v9, %s2170_s20  ;;  %779 = vrot.lane.b32.xlu0 %v2416_v9, %s2171_s28 }
 0x132   : > { %794 = vrot.lane.b32.xlu0 %v2416_v9, %s2172_s19 }
 0x194   : > { %v774_v13 = vpop.permute.xlu1 %773  ;;  %v783_v14 = vpop.permute.xlu0 %782 }
 0x195   : > { %v814_v15 = vpack.c.bf16 %v783_v14, %v783_v14  ;;  %v807_v24 = vmul.f32 0.35355338, %v774_v13 }
 0x197   : > { %v823_v16 = vsel %vm818_vm3, %v814_v15, 0  ;;  %v811_v30 = vpack.c.bf16 %v807_v24, %v807_v24 }
 0x198   : > { %v789_v17 = vpop.permute.xlu1 %788  ;;  %1872 = vmatpush3.bf16.xpose.msra.mxu1 %v823_v16  ;;  %v786_v18 = vpop.permute.xlu0 %785 }
 0x199   : > { %v815_v19 = vpack.c.bf16 %v786_v18, %v786_v18  ;;  %1883 = vmatprep.subr.bf16.mxu1 %v2162_v3  ;;  %v816_v21 = vpack.c.bf16 %v789_v17, %v789_v17 }
 0x19b   : > { %v869_v22 = vsel %vm818_vm3, %v815_v19, 0  ;;  %v915_v27 = vsel %vm818_vm3, %v816_v21, 0 }
 0x19c   : > { %1878 = vmatpush3.bf16.xpose.msra.mxu0 %v869_v22  ;;  %v792_v23 = vpop.permute.xlu0 %791  ;;  %v777_v26 = vpop.permute.xlu1 %776 }
 0x19d   : > { %1889 = vmatprep.subr.bf16.mxu0 %v2162_v3  ;;  %v817_v28 = vpack.c.bf16 %v792_v23, %v792_v23  ;;  %v808_v31 = vmul.f32 0.35355338, %v777_v26 }
 0x19f   : > { %1874 = vmatmul.mubr.msk.bf16.vlgmr.msra.gmra.mrb[0].mxu1 %vm818_vm3, %v810_v25  ;;  %v961_v32 = vsel %vm818_vm3, %v817_v28, 0  ;;  %v812_v35 = vpack.c.bf16 %v808_v31, %v808_v31 }
 0x1a0   : > { %v780_v29 = vpop.permute.xlu0 %779  ;;  %1884 = vmatpush3.bf16.xpose.msra.mxu1 %v915_v27  ;;  %1885 = vmatprep.mubr.msk.bf16.mxu1 %vm2163_vm1, %v2162_v3  ;;  %v798_v33 = vpop.permute.xlu1 %797 }
 0x1a1   : > { %1895 = vmatprep.subr.bf16.mxu1 %v2162_v3  ;;  %v809_v36 = vmul.f32 0.35355338, %v780_v29  ;;  %v1044_v38 = vpack.c.bf16 %v798_v33, %v798_v33 }
 0x1a3   : > { %1880 = vmatmul.mubr.msk.bf16.vlgmr.msra.gmra.mrb[4].mxu0 %vm818_vm3, %v811_v30  ;;  %v813_v40 = vpack.c.bf16 %v809_v36, %v809_v36  ;;  %v1098_v41 = vsel %vm1050_vm4, %v1044_v38, 0  ;;  %v2037_v36 = vld [vmem:[%s2666_s25 + $0x8] sm:$0xff]  }
 0x1a4   : > { %1890 = vmatpush3.bf16.xpose.msra.mxu0 %v961_v32  ;;  %v795_v34 = vpop.permute.xlu0 %794  ;;  %1891 = vmatprep.mubr.msk.bf16.mxu0 %vm2163_vm1, %v2162_v3  ;;  %v2036_v32 = vld [vmem:[%s2666_s25] sm:$0xff]   ;;  %s2669_s25 = scalar_lea.vmem %s2613_s8, %s2337_s18 }
 0x1a5   : > { %v1043_v37 = vpack.c.bf16 %v795_v34, %v795_v34  ;;  %1901 = vmatprep.subr.bf16.mxu0 %v2162_v3 }
 0x1a7   : > { %v1052_v39 = vsel %vm1050_vm4, %v1043_v37, 0  ;;  %1886 = vmatmul.mubr.msk.bf16.vlgmr.msra.gmra.mrb[4].mxu1 %vm818_vm3, %v812_v35 }
 0x1a8   : > { %1896 = vmatpush3.bf16.msra.mxu1 %v1052_v39  ;;  %1897 = vmatprep.mubr.msk.bf16.mxu1 %vm2163_vm1, %v2162_v3 }
 0x1a9   : > { %1907 = vmatprep.subr.bf16.mxu1 %v2162_v3 }
 0x1ab   : > { %1892 = vmatmul.mubr.msk.bf16.vlgmr.msra.gmra.mrb[8].mxu0 %vm818_vm3, %v813_v40 }
 0x1ac   : > { %1902 = vmatpush3.bf16.msra.mxu0 %v1098_v41  ;;  %1903 = vmatprep.mubr.msk.bf16.mxu0 %vm2163_vm1, %v2162_v3 }
 0x1ad   : > { %1913 = vmatprep.subr.bf16.mxu0 %v2162_v3 }
 0x272   : > { %v859_v42 = vpop.f32.mrb[0].mxu1 }
 0x273   : > { %v1875_v43 = vpop.f32.mrb[1].mxu1  ;;  %v1003_v44 = vsel %vm818_vm3, %v859_v42, -inf }
 0x274   : > { %1004 = vmax.xlane.f32.xlu1 %v1003_v44  ;;  %v862_v45 = vpop.f32.mrb[2].mxu1 }
 0x275   : > { %v1876_v46 = vpop.f32.mrb[3].mxu1 }
 0x276   : > { %v905_v47 = vpop.f32.mrb[4].mxu0 }
 0x277   : > { %v1881_v48 = vpop.f32.mrb[5].mxu0  ;;  %v1006_v49 = vsel %vm818_vm3, %v905_v47, -inf }
 0x278   : > { %1007 = vmax.xlane.f32.xlu0 %v1006_v49  ;;  %v908_v50 = vpop.f32.mrb[6].mxu0 }
 0x279   : > { %v1882_v51 = vpop.f32.mrb[7].mxu0 }
 0x27a   : > { %v951_v52 = vpop.f32.mrb[4].mxu1 }
 0x27b   : > { %v1887_v53 = vpop.f32.mrb[5].mxu1  ;;  %v1009_v54 = vsel %vm818_vm3, %v951_v52, -inf }
 0x27c   : > { %v954_v55 = vpop.f32.mrb[6].mxu1  ;;  %1010 = vmax.xlane.f32.xlu0 %v1009_v54 }
 0x27d   : > { %v1888_v56 = vpop.f32.mrb[7].mxu1 }
 0x27e   : > { %v997_v57 = vpop.f32.mrb[8].mxu0 }
 0x27f   : > { %v1893_v58 = vpop.f32.mrb[9].mxu0  ;;  %v1012_v59 = vsel %vm818_vm3, %v997_v57, -inf }
 0x280   : > { %1013 = vmax.xlane.f32.xlu1 %v1012_v59  ;;  %v1000_v60 = vpop.f32.mrb[10].mxu0 }
 0x281   : > { %v1894_v61 = vpop.f32.mrb[11].mxu0 }
 0x291   : > { %800 = vrot.lane.b32.xlu1 %v2416_v9, %s2173_s3  ;;  %s2668_s3 = scalar_lea.vmem %s2611_s6, %s2337_s18 }
 0x292   : > { %803 = vrot.lane.b32.xlu0 %v2416_v9, %s2174_s5 }
 0x301   : > { %v1005_v62 = vpop.xlane.xlu1 %1004 }
 0x302   : > { %v1015_v63 = vsub.f32 %v859_v42, %v1005_v62 }
 0x304   : > { %v1019_v0 = vmul.f32 1.442695, %v1015_v63 }
 0x305   : > { %v1008_v1 = vpop.xlane.xlu0 %1007 }
 0x306   : > { %2044 = vpow2.f32 %v1019_v0  ;;  %v1016_v2 = vsub.f32 %v905_v47, %v1008_v1 }
 0x308   : > { %v1021_v4 = vmul.f32 1.442695, %v1016_v2 }
 0x309   : > { %v1011_v6 = vpop.xlane.xlu0 %1010 }
 0x30a   : > { %2046 = vpow2.f32 %v1021_v4  ;;  %v1017_v7 = vsub.f32 %v951_v52, %v1011_v6  ;;  %v1804_v4 = vld [vmem:[%s2667_s24] ss:$0 sm:$0xff] }
 0x30c   : > { %v1023_v8 = vmul.f32 1.442695, %v1017_v7 }
 0x30d   : > { %v1014_v10 = vpop.xlane.xlu1 %1013  ;;  %v804_v13 = vpop.permute.xlu0 %803 }
 0x30e   : > { %2048 = vpow2.f32 %v1023_v8  ;;  %v1018_v11 = vsub.f32 %v997_v57, %v1014_v10  ;;  %v1046_v17 = vpack.c.bf16 %v804_v13, %v804_v13 }
 0x310   : > { %v2045_v12 = vpop.eup %2044  ;;  %v1025_v14 = vmul.f32 1.442695, %v1018_v11  ;;  %v1190_v22 = vsel %vm1050_vm4, %v1046_v17, 0 }
 0x311   : > { %v801_v15 = vpop.permute.xlu1 %800  ;;  %v1039_v16 = vpack.c.bf16 %v2045_v12, %v2045_v12  ;;  %v1027_v25 = vsel %vm818_vm3, %v2045_v12, 0.0 }
 0x312   : > { %2050 = vpow2.f32 %v1025_v14  ;;  %v1045_v9 = vpack.c.bf16 %v801_v15, %v801_v15 }
 0x313   : > { %1898 = vmatmul.mubr.msk.bf16.vlgmr.msra.gmra.mrb[8].mxu1 %vm818_vm3, %v1039_v16 }
 0x314   : > { %v2047_v18 = vpop.eup %2046  ;;  %v1144_v19 = vsel %vm1050_vm4, %v1045_v9, 0  ;;  %1909 = vmatprep.mubr.msk.bf16.mxu1 %vm2163_vm1, %v2162_v3 }
 0x315   : > { %1908 = vmatpush3.bf16.msra.mxu1 %v1144_v19  ;;  %v1030_v20 = vsel %vm818_vm3, %v2047_v18, 0.0  ;;  %v1040_v21 = vpack.c.bf16 %v2047_v18, %v2047_v18  ;;  %v2038_v18 = vld [vmem:[%s2362_s0] sm:$0xff]   ;;  %v2039_v19 = vld [vmem:[%s2362_s0 + $0x8] sm:$0xff]   ;;  %s2672_s0 = sld [smem:[#allocation25_spill]] (!%p1822_p1) }
 0x316   : > { %1031 = vadd.xlane.f32.xlu1 %v1030_v20  ;;  %1919 = vmatprep.subr.bf16.mxu1 %v2162_v3  ;;  %v2041_v20 = vld [vmem:[%s2376_s13 + $0x8] sm:$0xff]  }
 0x317   : > { %1904 = vmatmul.mubr.msk.bf16.vlgmr.msra.gmra.mrb[12].mxu0 %vm818_vm3, %v1040_v21 }
 0x318   : > { %v2049_v23 = vpop.eup %2048  ;;  %1914 = vmatpush3.bf16.msra.mxu0 %v1190_v22  ;;  %1915 = vmatprep.mubr.msk.bf16.mxu0 %vm2163_vm1, %v2162_v3 }
 0x319   : > { %v1033_v24 = vsel %vm818_vm3, %v2049_v23, 0.0  ;;  %v1041_v26 = vpack.c.bf16 %v2049_v23, %v2049_v23  ;;  %1927 = vmatprep.subr.bf16.mxu0 %v2162_v3 }
 0x31a   : > { %1034 = vadd.xlane.f32.xlu0 %v1033_v24  ;;  %1028 = vadd.xlane.f32.xlu1 %v1027_v25  ;;  %v1808_v25 = vld [vmem:[%s684_s26] ss:$0 sm:$0xff] }
 0x31b   : > { %1910 = vmatmul.mubr.msk.bf16.vlgmr.msra.gmra.mrb[12].mxu1 %vm818_vm3, %v1041_v26 }
 0x31c   : > { %v2051_v27 = vpop.eup %2050  ;;  %1923 = vmatprep.mubr.msk.bf16.mxu1 %vm2163_vm1, %v2162_v3  ;;  %1920 = vmatpush3.bf16.msra.mxu1 %v2036_v32  ;;  %v2043_v32 = vld [vmem:[%s2376_s13 + $0x18] sm:$0xff]  }
 0x31d   : > { %v1036_v28 = vsel %vm818_vm3, %v2051_v27, 0.0  ;;  %v1042_v29 = vpack.c.bf16 %v2051_v27, %v2051_v27  ;;  %1921 = vmatprep.subr.bf16.mxu1 %v2162_v3  ;;  %v1809_v27 = vld [vmem:[%s687_s29] ss:$0 sm:$0xff] }
 0x31e   : > { %1037 = vadd.xlane.f32.xlu0 %v1036_v28 }
 0x31f   : > { %1916 = vmatmul.mubr.msk.bf16.vlgmr.msra.gmra.mrb[16].mxu0 %vm818_vm3, %v1042_v29 }
 0x320   : > { %1931 = vmatprep.mubr.msk.bf16.mxu0 %vm2163_vm1, %v2162_v3  ;;  %1922 = vmatpush3.bf16.msra.mxu1 %v2037_v36 }
 0x321   : > { %1935 = vmatprep.subr.bf16.mxu1 %v2162_v3  ;;  %1928 = vmatpush3.bf16.msra.mxu0 %v2038_v18 }
 0x322   : > { %1929 = vmatprep.subr.bf16.mxu0 %v2162_v3 }
 0x325   : > { %1930 = vmatpush3.bf16.msra.mxu0 %v2039_v19 }
 0x3a3   : > { %v1032_v30 = vpop.xlane.xlu1 %1031 }
 0x3a4   : > { %2052 = vrcp.f32 %v1032_v30 }
 0x3a7   : > { %v1035_v31 = vpop.xlane.xlu0 %1034  ;;  %v1029_v57 = vpop.xlane.xlu1 %1028 }
 0x3a8   : > { %2054 = vrcp.f32 %v1035_v31  ;;  %v2042_v31 = vld [vmem:[%s2376_s13 + $0x10] sm:$0xff]  }
 0x3ab   : > { %v1038_v33 = vpop.xlane.xlu0 %1037 }
 0x3ac   : > { %2056 = vrcp.f32 %v1038_v33  ;;  %v1810_v33 = vld [vmem:[%s2668_s3] ss:$0 sm:$0xff] }
 0x3ad   : > { %2058 = vrcp.f32 %v1029_v57  ;;  %v1820_v57 = vld [vmem:[%s690_s1] ss:$0 sm:$0xff] }
 0x3ae   : > { %v2053_v39 = vpop.eup %2052 }
 0x3b2   : > { %v2055_v45 = vpop.eup %2054 }
 0x3b6   : > { %v2057_v51 = vpop.eup %2056 }
 0x3b7   : > { %v2059_v58 = vpop.eup %2058 }
 0x3e6   : > { %v1088_v34 = vpop.f32.mrb[8].mxu1 }
 0x3e7   : > { %v1899_v35 = vpop.f32.mrb[9].mxu1  ;;  %v1236_v61 = vmul.f32 %v2059_v58, %v1088_v34 }
 0x3e8   : > { %v1091_v37 = vpop.f32.mrb[10].mxu1 }
 0x3e9   : > { %v1900_v38 = vpop.f32.mrb[11].mxu1 }
 0x3ea   : > { %v1134_v40 = vpop.f32.mrb[12].mxu0 }
 0x3eb   : > { %v1237_v41 = vmul.f32 %v2053_v39, %v1134_v40  ;;  %v1905_v42 = vpop.f32.mrb[13].mxu0 }
 0x3ec   : > { %v1137_v43 = vpop.f32.mrb[14].mxu0 }
 0x3ed   : > { %1241 = vrot.lane.b32.xlu0 %v1237_v41, %s2175_s27  ;;  %v1906_v44 = vpop.f32.mrb[15].mxu0 }
 0x3ee   : > { %v1180_v46 = vpop.f32.mrb[12].mxu1 }
 0x3ef   : > { %v1238_v47 = vmul.f32 %v2055_v45, %v1180_v46  ;;  %v1911_v48 = vpop.f32.mrb[13].mxu1 }
 0x3f0   : > { %v1183_v49 = vpop.f32.mrb[14].mxu1 }
 0x3f1   : > { %1245 = vrot.lane.b32.xlu1 %v1238_v47, %s2176_s15  ;;  %v1912_v50 = vpop.f32.mrb[15].mxu1 }
 0x3f2   : > { %v1226_v52 = vpop.f32.mrb[16].mxu0 }
 0x3f3   : > { %v1239_v53 = vmul.f32 %v2057_v51, %v1226_v52  ;;  %v1917_v54 = vpop.f32.mrb[17].mxu0 }
 0x3f4   : > { %v1229_v55 = vpop.f32.mrb[18].mxu0 }
 0x3f5   : > { %1249 = vrot.lane.b32.xlu1 %v1239_v53, %s2177_s22  ;;  %v1918_v56 = vpop.f32.mrb[19].mxu0 }
 0x45f   : > { %v1242_v59 = vpop.permute.xlu0 %1241 }
 0x460   : > { %v1252_v62 = vsel %vm818_vm3, %v1236_v61, %v1242_v59  ;;  %v1821_v59 = vld [vmem:[%s693_s30] ss:$0 sm:$0xff]  ;;  %s2671_s30 = sld [smem:[#allocation24_spill]] (!%p1822_p1) }
 0x463   : > { %v1246_v60 = vpop.permute.xlu1 %1245 }
 0x464   : > { %v1254_v63 = vsel %vm1253_vm5, %v1252_v62, %v1246_v60 }
 0x467   : > { %v1250_v0 = vpop.permute.xlu1 %1249 }
 0x468   : > { %v1256_v1 = vsel %vm1255_vm6, %v1254_v63, %v1250_v0 }
 0x469   : > { %v1257_v2 = vpack.c.bf16 %v1256_v1, %v1256_v1 }
 0x46b   : > { %1924 = vmatmul.mubr.msk.bf16.vlgmr.msra.gmra.mrb[16].mxu1 %vm728_vm2, %v1257_v2 }
 0x46c   : > { %1943 = vmatprep.mubr.msk.bf16.mxu1 %vm2163_vm1, %v2162_v3 }
 0x53e   : > { %v1318_v6 = vpop.f32.mrb[16].mxu1 }
 0x53f   : > { %v1319_v7 = vadd.f32 %v1804_v4, %v1318_v6  ;;  %v1925_v8 = vpop.f32.mrb[17].mxu1 }
 0x540   : > { %v1321_v10 = vpop.f32.mrb[18].mxu1 }
 0x541   : > { %v1926_v11 = vpop.f32.mrb[19].mxu1  ;;  %v1324_v12 = vadd.f32 %v1319_v7, %v2400_v5  ;;  %v2040_v5 = vld [vmem:[%s2376_s13] sm:$0xff]  }
 0x542   : > { %1936 = vmatpush3.bf16.msra.mxu1 %v2040_v5  ;;  %v1823_v11 = vld [vmem:[%s2671_s30] ss:$0 sm:$0xff] (!%p1822_p1) }
 0x543   : > { %v1327_v13 = vsel %vm728_vm2, %v1324_v12, 0.0  ;;  %1937 = vmatprep.subr.bf16.mxu1 %v2162_v3 }
 0x544   : > { %1328 = vadd.xlane.f32.xlu0 %v1327_v13  ;;  %v1824_v13 = vld [vmem:[%s2672_s0] ss:$0 sm:$0xff] (!%p1822_p1) }
 0x546   : > { %1938 = vmatpush3.bf16.msra.mxu1 %v2041_v20 }
 0x547   : > { %1939 = vmatprep.subr.bf16.mxu1 %v2162_v3 }
 0x54a   : > { %1940 = vmatpush3.bf16.msra.mxu1 %v2042_v31 }
 0x54b   : > { %1941 = vmatprep.subr.bf16.mxu1 %v2162_v3  ;;  %v1814_v3 = vld [vmem:[%s2669_s25] ss:$0 sm:$0xff] }
 0x54e   : > { %1942 = vmatpush3.bf16.msra.mxu1 %v2043_v32 }
 0x5d1   : > { %v1329_v14 = vpop.xlane.xlu0 %1328 }
 0x5d2   : > { %v1331_v15 = vmul.f32 0.03125, %v1329_v14 }
 0x5d4   : > { %v1332_v16 = vsub.f32 %v1324_v12, %v1331_v15 }
 0x5d6   : > { %v1333_v9 = vmul.f32 %v1332_v16, %v1332_v16 }
 0x5d8   : > { %v1334_v17 = vsel %vm728_vm2, %v1333_v9, 0.0 }
 0x5d9   : > { %1335 = vadd.xlane.f32.xlu1 %v1334_v17 }
 0x666   : > { %v1336_v21 = vpop.xlane.xlu1 %1335 }
 0x667   : > { %v1337_v22 = vmul.f32 0.03125, %v1336_v21 }
 0x669   : > { %v1338_v23 = vadd.f32 1e-05, %v1337_v22 }
 0x66b   : > { %2060 = vrsqrt.f32 %v1338_v23 }
 0x675   : > { %v2061_v24 = vpop.eup %2060 }
 0x676   : > { %v1340_v26 = vmul.f32 %v2061_v24, %v1332_v16 }
 0x678   : > { %v1347_v28 = vmul.f32 %v1808_v25, %v1340_v26 }
 0x67a   : > { %v1354_v29 = vadd.f32 %v1809_v27, %v1347_v28 }
 0x67c   : > { %v1355_v30 = vpack.c.bf16 %v1354_v29, %v1354_v29 }
 0x67e   : > { %1932 = vmatmul.mubr.msk.bf16.vlgmr.msra.gmra.mrb[20].mxu0 %vm728_vm2, %v1355_v30 }
 0x751   : > { %v1416_v34 = vpop.f32.mrb[20].mxu0 }
 0x752   : > { %v1417_v35 = vadd.f32 %v1810_v33, %v1416_v34  ;;  %v1933_v36 = vpop.f32.mrb[21].mxu0 }
 0x753   : > { %v1419_v37 = vpop.f32.mrb[22].mxu0 }
 0x754   : > { %v1422_v38 = vmax.f32 %v1417_v35, 0.0  ;;  %v1934_v39 = vpop.f32.mrb[23].mxu0 }
 0x756   : > { %v1423_v40 = vpack.c.bf16 %v1422_v38, %v1422_v38 }
 0x758   : > { %1944 = vmatmul.mubr.msk.bf16.vlgmr.msra.gmra.mrb[20].mxu1 %vm1463_vm7, %v1423_v40 }
 0x82b   : > { %v1501_v41 = vpop.f32.mrb[20].mxu1 }
 0x82c   : > { %v1502_v42 = vadd.f32 %v1814_v3, %v1501_v41  ;;  %v1945_v43 = vpop.f32.mrb[21].mxu1 }
 0x82d   : > { %v1504_v44 = vpop.f32.mrb[22].mxu1 }
 0x82e   : > { %v1946_v45 = vpop.f32.mrb[23].mxu1  ;;  %v1507_v46 = vadd.f32 %v1502_v42, %v1354_v29 }
 0x830   : > { %v1510_v47 = vsel %vm728_vm2, %v1507_v46, 0.0 }
 0x831   : > { %1511 = vadd.xlane.f32.xlu0 %v1510_v47 }
 0x8be   : > { %v1512_v48 = vpop.xlane.xlu0 %1511 }
 0x8bf   : > { %v1513_v49 = vmul.f32 0.03125, %v1512_v48 }
 0x8c1   : > { %v1514_v50 = vsub.f32 %v1507_v46, %v1513_v49 }
 0x8c3   : > { %v1515_v51 = vmul.f32 %v1514_v50, %v1514_v50 }
 0x8c5   : > { %v1516_v52 = vsel %vm728_vm2, %v1515_v51, 0.0 }
 0x8c6   : > { %1517 = vadd.xlane.f32.xlu0 %v1516_v52 }
 0x953   : > { %v1518_v53 = vpop.xlane.xlu0 %1517 }
 0x954   : > { %v1519_v54 = vmul.f32 0.03125, %v1518_v53 }
 0x956   : > { %v1520_v55 = vadd.f32 1e-05, %v1519_v54 }
 0x958   : > { %2062 = vrsqrt.f32 %v1520_v55 }
 0x962   : > { %v2063_v56 = vpop.eup %2062 }
 0x963   : > { %v1522_v58 = vmul.f32 %v2063_v56, %v1514_v50  ;;  %1541 = sbr.rel (%p1822_p1) target bundleno = 2723 (0xaa3), region = 88 }
 0x965   : > { %v1529_v60 = vmul.f32 %v1820_v57, %v1522_v58 }
 0x967   : > { %v1536_v61 = vadd.f32 %v1821_v59, %v1529_v60 }
 0x969   : > { %1537 = vst.msk [vmem:[#allocation2] sm:$0xff] %vm728_vm2, %v1536_v61  ;;  %v1544_v62 = vsel (!%p1822_p1), %vm728_vm2, %v1536_v61, 0.0 }
 0x96a   : > { %1545 = vadd.xlane.f32.xlu0 %v1544_v62 }
 0x9f7   : > { %v1546_v63 = vpop.xlane.xlu0 %1545 }
 0x9f8   : > { %v1547_v0 = vmul.f32 0.03125, %v1546_v63 }
 0x9fa   : > { %v1548_v1 = vsub.f32 %v1536_v61, %v1547_v0 }
 0x9fc   : > { %v1549_v2 = vmul.f32 %v1548_v1, %v1548_v1 }
 0x9fe   : > { %v1550_v4 = vsel %vm728_vm2, %v1549_v2, 0.0 }
 0x9ff   : > { %1551 = vadd.xlane.f32.xlu0 %v1550_v4 }
 0xa8c   : > { %v1552_v6 = vpop.xlane.xlu0 %1551 }
 0xa8d   : > { %v1553_v7 = vmul.f32 0.03125, %v1552_v6 }
 0xa8f   : > { %v1554_v8 = vadd.f32 1e-05, %v1553_v7 }
 0xa91   : > { %2064 = vrsqrt.f32 %v1554_v8 }
 0xa9b   : > { %v2065_v10 = vpop.eup %2064 }
 0xa9c   : > { %v1556_v12 = vmul.f32 %v2065_v10, %v1548_v1 }
 0xa9e   : > { %v1563_v14 = vmul.f32 %v1823_v11, %v1556_v12 }
 0xaa0   : > { %v1570_v15 = vadd.f32 %v1824_v13, %v1563_v14 }
 0xaa2   : > { %1571 = vst.msk [vmem:[%s645_s14] sm:$0xff] %vm728_vm2, %v1570_v15 }
 0xaa3 PF: > { %s2673_s17 = sld [smem:[#allocation10_spill]]  ;;  %s2674_s20 = sld [smem:[#allocation7_spill]] }
 0xaa4   : > { %s2676_s29 = sld [smem:[#allocation26_spill]]  ;;  %s1586_s25 = sshll.u32 %s645_s14, 4  ;;  %s1587_s25 = int_to_ptr.vmem [resolvable:$true] %s1586_s25 }
 0xaa5   : > { %s2066_s15 = scalar_lea.vmem %s1587_s25, 128  ;;  %s2178_s22 = smov [#allocation3]  }
 0xaa6   : > { %p2067_p2 = scmp.ne.s32.totalorder %s1587_s25, %s2066_s15  ;;  %s2070_s21 = sshll.u32 %s2178_s22, 4  ;;  %s2071_s21 = int_to_ptr.vmem [resolvable:$false] %s2070_s21 }
 0xaa7   : > { %s2072_s1 = scalar_lea.vmem %s2071_s21, 256  ;;  %p2073_p6 = scmp.lt.s32.totalorder %s1587_s25, %s2071_s21 }
 0xaa8   : > { %p2068_p4 = pnand %p2067_p2, %p2308_p3  ;;  %p2074_p7 = scmp.lt.s32.totalorder %s2072_s1, %s2066_s15 }
 0xaa9   : > { %s1826_s19 = sshll.u32 %s2673_s17, 7  ;;  %s2677_s13 = sand.u32 1, %s2674_s20  }
 0xaaa   : > { %s2554_s5 = scalar_lea.hbm %s2676_s29, %s1826_s19  ;;  %s1573_s27 = scalar_lea.sflag [#allocation4], %s2677_s13 }
 0xaab   : > { %p2069_p5 = pneg %p2068_p4  ;;  %p2075_p8 = por %p2074_p7, %p2073_p6 }
 0xaad   : > { %p2076_p10 = pnand %p2075_p8, %p2069_p5 }
 0xaaf   : > { %2079 = shalt.err (!%p2076_p10)
}
 0xab0   : > { %s2080_s23 = scalar_lea.hbm %s2554_s5, 128  ;;  %s2084_s30 = scalar_lea.hbm %s2676_s29, 256 }
 0xab1   : > { %p2081_p11 = scmp.ne.s32.totalorder %s2554_s5, %s2080_s23  ;;  %p2085_p0 = scmp.lt.u32.totalorder %s2554_s5, %s2676_s29 }
 0xab2   : > { %p2086_p1 = scmp.lt.u32.totalorder %s2084_s30, %s2080_s23  ;;  %p2088_p4 = scmp.lt.u32.totalorder %s2080_s23, %s2554_s5 }
 0xab3   : > { %p2082_p12 = pnand %p2081_p11, %p2308_p3 }
 0xab4   : > { %p2087_p2 = por %p2086_p1, %p2085_p0 }
 0xab5   : > { %p2083_p13 = pneg %p2082_p12 }
 0xab6   : > { %p2089_p5 = por %p2088_p4, %p2087_p2 }
 0xab8   : > { %p2090_p6 = pnand %p2089_p5, %p2083_p13 }
 0xaba   : > { %2093 = shalt.err (!%p2090_p6)
}
 0xabb   : > { %1947 = dma.vmem_to_hbm [thread:$0]  (%p2308_p3), %s1587_s25, 128, %s2554_s5, %s1573_s27  }
 0xabc PF: > { %s2678_s0 = sld [smem:[#allocation13_spill]]  ;;  %s2679_s17 = sld [smem:[#allocation6_spill]] }
 0xac2   : > { %p1953_p7 = scmp.ge.s32.totalorder %s2678_s0, 2  ;;  %s1598_s19 = sand.u32 1, %s2679_s17  }
 0xac3   : > { %s1599_s26 = scalar_lea.sflag [#allocation4], %s1598_s19 }
 0xac4   : > { %p1950_p8 = pnand %p1953_p7, %p2318_p9 }
 0xac6   : > { %2127 = dma.done.wait (!%p1950_p8), %s1599_s26, 128  }
 0xac7   : > { %2129 = vsyncadd (!%p1950_p8), %s1599_s26, 4294967168  ;;  %s28_s25 = sadd.s32 1, %s2678_s0   ;;  %s2681_s18 = sld [smem:[#allocation7_spill]] }
 0xac8   : > { %p25_p10 = scmp.ge.s32.totalorder %s28_s25, 6   ;;  %s2682_s19 = sld [smem:[#allocation8_spill]] }
 0xac9   : > { %s2683_s20 = sld [smem:[#allocation18_spill]]  ;;  %s2684_s21 = sld [smem:[#allocation11_spill]] }
 0xaca   : > { %s2685_s22 = sld [smem:[#allocation12_spill]]  ;;  %s2686_s23 = sld [smem:[#allocation14_spill]] }
 0xacb   : > { %s2687_s24 = sld [smem:[#allocation16_spill]]  ;;  %27 = sbr.rel (!%p25_p10) target bundleno = 13 (0xd), region = 159 }
 0xad2   :  { %1604 = vsyncpa [#allocation4], 1 }
 0xad3   :  { %1606 = vsyncpa [#allocation4 + $0x1], 1 }

</bundles_post_ra>
